<compile_context>
chip_gen: v6e
topology: v6e:2x2x1
jax: 0.10.0
libtpu: 0.0.40
codegen_flags: <defaults>
</compile_context>

<pallas_src>
import functools

import jax
import jax.numpy as jnp
from jax.experimental import pallas as pl
from jax.experimental.pallas import tpu as pltpu


def _law_attn_kernel(q_ref, v_ref, ls_ref, wq_ref, wv_ref, cw_ref,
                     bias_ref, ws_ref, bs_ref, ctx_ref, attn_ref):
    Bb, T, D = v_ref.shape

    q = q_ref[...]          # (Bb, D)     decoder features (q_len == 1, squeezed)
    v = v_ref[...]          # (Bb, T, D)  encoder features
    ls = ls_ref[...]        # (Bb, T, 3)  last_attn taps [t-1, t, t+1]
    wq = wq_ref[...]        # (D, D)      query_proj weight (in, out)
    wv = wv_ref[...]        # (D, D)      value_proj weight (in, out)
    cw = cw_ref[...]        # (3, D)      conv1d weight (K, out)
    bias = bias_ref[...]    # (1, D) f32  attention bias + conv bias (folded on host)
    ws = ws_ref[...]        # (1, D) f32  score_proj weight
    bs = bs_ref[0, 0]       # scalar      score_proj bias (SMEM)

    f32 = jnp.float32
    # Projections for the whole batch block at once (MXU-row dense, f32 accumulate).
    vp = jnp.dot(v.reshape(Bb * T, D), wv,
                 preferred_element_type=f32).reshape(Bb, T, D)
    conv = jnp.dot(ls.reshape(Bb * T, 3), cw,
                   preferred_element_type=f32).reshape(Bb, T, D)
    qb = jnp.dot(q, wq, preferred_element_type=f32) + bias           # (Bb, D)

    s = jnp.tanh(vp + conv + qb[:, None, :])                         # (Bb, T, D)

    # score[b, t] = ws . s[b, t, :] + bs  (lane reduction -> XLU; MXU stays free)
    score = jnp.sum(s * ws[None], axis=-1) + bs                      # (Bb, T)

    # smoothing=True branch: sigmoid, then normalize by the row sum.
    # exp and the approximate reciprocal both live on the EUP slot.
    sig = pl.reciprocal(1.0 + jnp.exp(-score), approx=True)          # (Bb, T)
    denom = jnp.sum(sig, axis=-1, keepdims=True)                     # (Bb, 1)
    attn = sig * pl.reciprocal(denom, approx=True)                   # (Bb, T)

    # context[b, :] = attn[b, :] @ value[b]   (flash-style batched matmul, q_len=1)
    ctx = jnp.einsum("bqt,btd->bqd", attn[:, None, :].astype(v.dtype), v,
                     preferred_element_type=f32)[:, 0, :]            # (Bb, D)

    ctx_ref[...] = ctx.astype(ctx_ref.dtype)
    attn_ref[...] = attn.astype(attn_ref.dtype)


def _pick_batch_block(B, T, D, itemsize):
    """Batch rows per grid step: as many as fit a conservative VMEM budget."""
    # Keep the double-buffered value tile around <= 8 MiB so the whole pipeline sits
    # comfortably inside v7x's 64 MiB VMEM (and the 32 MiB default scoped limit).
    cap = max(1, (8 << 20) // max(1, 2 * T * D * itemsize))
    if B <= cap:
        return B                               # block == full batch dim: always legal
    bb = 0
    for cand in range(8, cap + 1, 8):          # prefer sublane-aligned 2-D batch blocks
        if B % cand == 0:
            bb = cand
    if bb == 0:                                # fallback: largest divisor within budget
        for cand in range(1, cap + 1):
            if B % cand == 0:
                bb = cand
    return bb


@functools.partial(jax.jit, static_argnames=("batch_block", "matmul_dtype"))
def location_aware_attention(query, value, last_attn, params, *,
                             batch_block=None, matmul_dtype=jnp.float32):
    """query (B, 1, D) or (B, D); value (B, T, D); last_attn (B, T) or None."""
    B, T, D = value.shape
    if last_attn is None:
        last_attn = jnp.zeros((B, T), jnp.float32)

    mm = jnp.dtype(matmul_dtype)
    q2 = query.reshape(B, D).astype(mm)
    v = value.astype(mm)

    # 3-tap stack of the previous alignment == the padded Conv1d(in=1, K=3, pad=1)
    # input; tiny (B, T, 3) tensor, built on the host instead of O(T^2) shift matrices.
    la_pad = jnp.pad(last_attn.astype(mm), ((0, 0), (1, 1)))
    la_stack = jnp.stack(
        [la_pad[:, 0:T], la_pad[:, 1:T + 1], la_pad[:, 2:T + 2]], axis=-1)  # (B, T, 3)

    wq = params["wq"].astype(mm)                                  # (D, D)
    wv = params["wv"].astype(mm)                                  # (D, D)
    cw = params["cw"].astype(mm)                                  # (3, D)
    bias = (params["bias"] + params["cb"]).astype(jnp.float32)    # fold conv bias
    ws = params["ws"].astype(jnp.float32)                         # (1, D)
    bs = params["bs"].astype(jnp.float32).reshape(1, 1)           # scalar -> SMEM

    Bb = _pick_batch_block(B, T, D, mm.itemsize) if batch_block is None else batch_block
    grid = (B // Bb,)   # Bb is chosen to divide B

    ctx, attn = pl.pallas_call(
        _law_attn_kernel,
        out_shape=(jax.ShapeDtypeStruct((B, D), jnp.float32),
                   jax.ShapeDtypeStruct((B, T), jnp.float32)),
        grid_spec=pltpu.PrefetchScalarGridSpec(
            num_scalar_prefetch=0,
            grid=grid,
            in_specs=[
                pl.BlockSpec((Bb, D), lambda b: (b, 0)),             # query
                pl.BlockSpec((Bb, T, D), lambda b: (b, 0, 0)),       # value
                pl.BlockSpec((Bb, T, 3), lambda b: (b, 0, 0)),       # last_attn taps
                pl.BlockSpec((D, D), lambda b: (0, 0)),              # W_q (grid-invariant)
                pl.BlockSpec((D, D), lambda b: (0, 0)),              # W_v (grid-invariant)
                pl.BlockSpec((3, D), lambda b: (0, 0)),              # conv weight
                pl.BlockSpec((1, D), lambda b: (0, 0)),              # bias (attn + conv)
                pl.BlockSpec((1, D), lambda b: (0, 0)),              # score_proj weight
                pl.BlockSpec(memory_space=pltpu.MemorySpace.SMEM),   # score_proj bias
            ],
            out_specs=[
                pl.BlockSpec((Bb, D), lambda b: (b, 0)),             # context
                pl.BlockSpec((Bb, T), lambda b: (b, 0)),             # attention
            ],
        ),
        compiler_params=pltpu.CompilerParams(
            dimension_semantics=("parallel",)),   # independent batch blocks (2 TCs on v7x)
    )(q2, v, la_stack, wq, wv, cw, bias, ws, bs)
    return ctx, attn


def reference(query, value, last_attn, p):
    """Plain-JAX mirror of the PyTorch forward (smoothing=True, q_len == 1)."""
    B, T, D = value.shape
    la_pad = jnp.pad(last_attn, ((0, 0), (1, 1)))
    stacked = jnp.stack([la_pad[:, k:k + T] for k in range(3)], axis=-1)   # (B,T,3)
    conv_attn = stacked @ p["cw"] + p["cb"][0]                             # (B,T,D)
    qp = query.reshape(B, D) @ p["wq"]                                     # (B,D)
    vp = value @ p["wv"]                                                   # (B,T,D)
    s = jnp.tanh(qp[:, None, :] + vp + conv_attn + p["bias"][0])
    score = jnp.einsum("btd,d->bt", s, p["ws"][0]) + p["bs"][0, 0]
    score = jax.nn.sigmoid(score)
    attn = score / jnp.sum(score, axis=-1, keepdims=True)
    context = jnp.einsum("bt,btd->bd", attn, value)
    return context, attn


if __name__ == "__main__":
    B, T, D = 2, 8, 32   # batch, v_len, d_model (q_len = 1)

    key = jax.random.PRNGKey(0)
    keys = jax.random.split(key, 10)
    params = {
        "wq":   jax.random.uniform(keys[0], (D, D), jnp.float32, -0.1, 0.1),
        "wv":   jax.random.uniform(keys[1], (D, D), jnp.float32, -0.1, 0.1),
        "cw":   jax.random.uniform(keys[2], (3, D), jnp.float32, -0.1, 0.1),
        "cb":   jax.random.uniform(keys[3], (1, D), jnp.float32, -0.1, 0.1),
        "bias": jax.random.uniform(keys[4], (1, D), jnp.float32, -0.1, 0.1),
        "ws":   jax.random.uniform(keys[5], (1, D), jnp.float32, -0.1, 0.1),
        "bs":   jax.random.uniform(keys[6], (1, 1), jnp.float32, -0.1, 0.1),
    }
    query = jax.random.normal(keys[7], (B, 1, D), jnp.float32)
    value = jax.random.normal(keys[8], (B, T, D), jnp.float32)
    last_attn = jax.nn.softmax(jax.random.normal(keys[9], (B, T), jnp.float32), axis=-1)

    ref_ctx, ref_attn = reference(query, value, last_attn, params)

    # f32 path (default). Tolerance leaves room for the two EUP approximate
    # reciprocals (sigmoid + smoothing normalization) requested by the perf review.
    ctx, attn = location_aware_attention(query, value, last_attn, params)
    jax.block_until_ready((ctx, attn))
    assert ctx.shape == (B, D) and attn.shape == (B, T)
    assert jnp.allclose(ctx, ref_ctx, atol=1e-2, rtol=1e-2)
    assert jnp.allclose(attn, ref_attn, atol=1e-2, rtol=1e-2)

    # bf16 matmul operands (recommended on v6e/v7x); accumulation / elementwise stay f32.
    ctx16, attn16 = location_aware_attention(query, value, last_attn, params,
                                             matmul_dtype=jnp.bfloat16)
    jax.block_until_ready((ctx16, attn16))
    assert jnp.allclose(ctx16, ref_ctx, atol=4e-2, rtol=4e-2)
    assert jnp.allclose(attn16, ref_attn, atol=4e-2, rtol=4e-2)

    print("KERNEL_OK")
</pallas_src>

<mosaic_0001>
module attributes {stable_mosaic.version = 11 : i64} {
  func.func @_law_attn_kernel(%arg0: i32, %arg1: memref<2x32xf32, #tpu.memory_space<vmem>>, %arg2: memref<2x8x32xf32, #tpu.memory_space<vmem>>, %arg3: memref<2x8x3xf32, #tpu.memory_space<vmem>>, %arg4: memref<32x32xf32, #tpu.memory_space<vmem>>, %arg5: memref<32x32xf32, #tpu.memory_space<vmem>>, %arg6: memref<3x32xf32, #tpu.memory_space<vmem>>, %arg7: memref<1x32xf32, #tpu.memory_space<vmem>>, %arg8: memref<1x32xf32, #tpu.memory_space<vmem>>, %arg9: memref<1x1xf32, #tpu.memory_space<smem>>, %arg10: memref<2x32xf32, #tpu.memory_space<vmem>>, %arg11: memref<2x8xf32, #tpu.memory_space<vmem>>) attributes {dimension_semantics = [#tpu.dimension_semantics<parallel>], iteration_bounds = array<i64: 1>, scalar_prefetch = 0 : i64, scratch_operands = 0 : i64, tpu.core_type = #tpu.core_type<tc>, window_params = [{transform_indices = @transform_0, window_bounds = array<i64: 2, 32>}, {transform_indices = @transform_1, window_bounds = array<i64: 2, 8, 32>}, {transform_indices = @transform_2, window_bounds = array<i64: 2, 8, 3>}, {pipeline_mode = #tpu.pipeline_mode<synchronous>, transform_indices = @transform_3, window_bounds = array<i64: 32, 32>}, {pipeline_mode = #tpu.pipeline_mode<synchronous>, transform_indices = @transform_4, window_bounds = array<i64: 32, 32>}, {pipeline_mode = #tpu.pipeline_mode<synchronous>, transform_indices = @transform_5, window_bounds = array<i64: 3, 32>}, {pipeline_mode = #tpu.pipeline_mode<synchronous>, transform_indices = @transform_6, window_bounds = array<i64: 1, 32>}, {pipeline_mode = #tpu.pipeline_mode<synchronous>, transform_indices = @transform_7, window_bounds = array<i64: 1, 32>}, {transform_indices = @transform_8, window_bounds = array<i64: 1, 1>}, {transform_indices = @transform_9, window_bounds = array<i64: 2, 32>}, {transform_indices = @transform_10, window_bounds = array<i64: 2, 8>}]} {
    %c0 = arith.constant 0 : index
    %c0_0 = arith.constant 0 : index
    %0 = vector.load %arg1[%c0, %c0_0] : memref<2x32xf32, #tpu.memory_space<vmem>>, vector<2x32xf32>
    %c0_1 = arith.constant 0 : index
    %c0_2 = arith.constant 0 : index
    %c0_3 = arith.constant 0 : index
    %1 = vector.load %arg2[%c0_1, %c0_2, %c0_3] : memref<2x8x32xf32, #tpu.memory_space<vmem>>, vector<2x8x32xf32>
    %c0_4 = arith.constant 0 : index
    %c0_5 = arith.constant 0 : index
    %c0_6 = arith.constant 0 : index
    %2 = vector.load %arg3[%c0_4, %c0_5, %c0_6] : memref<2x8x3xf32, #tpu.memory_space<vmem>>, vector<2x8x3xf32>
    %c0_7 = arith.constant 0 : index
    %c0_8 = arith.constant 0 : index
    %3 = vector.load %arg4[%c0_7, %c0_8] : memref<32x32xf32, #tpu.memory_space<vmem>>, vector<32x32xf32>
    %c0_9 = arith.constant 0 : index
    %c0_10 = arith.constant 0 : index
    %4 = vector.load %arg5[%c0_9, %c0_10] : memref<32x32xf32, #tpu.memory_space<vmem>>, vector<32x32xf32>
    %c0_11 = arith.constant 0 : index
    %c0_12 = arith.constant 0 : index
    %5 = vector.load %arg6[%c0_11, %c0_12] : memref<3x32xf32, #tpu.memory_space<vmem>>, vector<3x32xf32>
    %c0_13 = arith.constant 0 : index
    %c0_14 = arith.constant 0 : index
    %6 = vector.load %arg7[%c0_13, %c0_14] : memref<1x32xf32, #tpu.memory_space<vmem>>, vector<1x32xf32>
    %c0_15 = arith.constant 0 : index
    %c0_16 = arith.constant 0 : index
    %7 = vector.load %arg8[%c0_15, %c0_16] : memref<1x32xf32, #tpu.memory_space<vmem>>, vector<1x32xf32>
    %c0_17 = arith.constant 0 : index
    %c0_18 = arith.constant 0 : index
    %8 = memref.load %arg9[%c0_17, %c0_18] : memref<1x1xf32, #tpu.memory_space<smem>>
    %9 = vector.shape_cast %1 : vector<2x8x32xf32> to vector<16x32xf32>
    %cst = arith.constant dense<0.000000e+00> : vector<16x32xf32>
    %10 = tpu.matmul %9, %4, %cst {dimension_numbers = #tpu.dot_dimension_numbers<[1], [0], [0], [1], [0, 0, 1, 1], [], []>} : vector<16x32xf32>, vector<32x32xf32>, vector<16x32xf32> -> vector<16x32xf32>
    %11 = vector.shape_cast %10 : vector<16x32xf32> to vector<2x8x32xf32>
    %12 = vector.shape_cast %2 : vector<2x8x3xf32> to vector<16x3xf32>
    %cst_19 = arith.constant dense<0.000000e+00> : vector<16x32xf32>
    %13 = tpu.matmul %12, %5, %cst_19 {dimension_numbers = #tpu.dot_dimension_numbers<[1], [0], [0], [1], [0, 0, 1, 1], [], []>} : vector<16x3xf32>, vector<3x32xf32>, vector<16x32xf32> -> vector<16x32xf32>
    %14 = vector.shape_cast %13 : vector<16x32xf32> to vector<2x8x32xf32>
    %cst_20 = arith.constant dense<0.000000e+00> : vector<2x32xf32>
    %15 = tpu.matmul %0, %3, %cst_20 {dimension_numbers = #tpu.dot_dimension_numbers<[1], [0], [0], [1], [0, 0, 1, 1], [], []>} : vector<2x32xf32>, vector<32x32xf32>, vector<2x32xf32> -> vector<2x32xf32>
    %16 = vector.broadcast %6 : vector<1x32xf32> to vector<2x32xf32>
    %17 = arith.addf %15, %16 : vector<2x32xf32>
    %18 = arith.addf %11, %14 : vector<2x8x32xf32>
    %19 = vector.shape_cast %17 : vector<2x32xf32> to vector<2x1x32xf32>
    %20 = vector.broadcast %19 : vector<2x1x32xf32> to vector<2x8x32xf32>
    %21 = arith.addf %18, %20 : vector<2x8x32xf32>
    %22 = math.tanh %21 : vector<2x8x32xf32>
    %23 = vector.shape_cast %7 : vector<1x32xf32> to vector<1x1x32xf32>
    %24 = vector.broadcast %23 : vector<1x1x32xf32> to vector<2x8x32xf32>
    %25 = arith.mulf %22, %24 : vector<2x8x32xf32>
    %cst_21 = arith.constant dense<0.000000e+00> : vector<2x8xf32>
    %26 = vector.multi_reduction <add>, %25, %cst_21 [2] : vector<2x8x32xf32> to vector<2x8xf32>
    %27 = vector.broadcast %8 : f32 to vector<2x8xf32>
    %28 = arith.addf %26, %27 : vector<2x8xf32>
    %cst_22 = arith.constant 0.000000e+00 : f32
    %29 = vector.broadcast %cst_22 : f32 to vector<2x8xf32>
    %30 = arith.subf %29, %28 : vector<2x8xf32>
    %31 = math.exp %30 : vector<2x8xf32>
    %cst_23 = arith.constant 1.000000e+00 : f32
    %32 = vector.broadcast %cst_23 : f32 to vector<2x8xf32>
    %33 = arith.addf %32, %31 : vector<2x8xf32>
    %34 = tpu.reciprocal %33 {approx = true} : vector<2x8xf32> -> vector<2x8xf32>
    %cst_24 = arith.constant dense<0.000000e+00> : vector<2xf32>
    %35 = vector.multi_reduction <add>, %34, %cst_24 [1] : vector<2x8xf32> to vector<2xf32>
    %36 = vector.shape_cast %35 : vector<2xf32> to vector<2x1xf32>
    %37 = tpu.reciprocal %36 {approx = true} : vector<2x1xf32> -> vector<2x1xf32>
    %38 = vector.broadcast %37 : vector<2x1xf32> to vector<2x8xf32>
    %39 = arith.mulf %34, %38 : vector<2x8xf32>
    %40 = vector.shape_cast %39 : vector<2x8xf32> to vector<2x1x8xf32>
    "tpu.trace_start"() <{level = 10 : i32, message = "bqt,btd->bqd"}> : () -> ()
    %cst_25 = arith.constant dense<0.000000e+00> : vector<2x1x32xf32>
    %41 = tpu.matmul %40, %1, %cst_25 {dimension_numbers = #tpu.dot_dimension_numbers<[2], [1], [1], [2], [0, 0, 0, 1, 1, 2], [0], [0]>} : vector<2x1x8xf32>, vector<2x8x32xf32>, vector<2x1x32xf32> -> vector<2x1x32xf32>
    "tpu.trace_stop"() : () -> ()
    %42 = vector.shape_cast %41 : vector<2x1x32xf32> to vector<2x32xf32>
    %c0_26 = arith.constant 0 : index
    %c0_27 = arith.constant 0 : index
    %43 = vector.load %arg10[%c0_26, %c0_27] : memref<2x32xf32, #tpu.memory_space<vmem>>, vector<2x32xf32>
    tpu.vector_store %arg10[%c0_26, %c0_27], %42 {strides = array<i32>} : memref<2x32xf32, #tpu.memory_space<vmem>>, vector<2x32xf32>,
    %c0_28 = arith.constant 0 : index
    %c0_29 = arith.constant 0 : index
    %44 = vector.load %arg11[%c0_28, %c0_29] : memref<2x8xf32, #tpu.memory_space<vmem>>, vector<2x8xf32>
    tpu.vector_store %arg11[%c0_28, %c0_29], %39 {strides = array<i32>} : memref<2x8xf32, #tpu.memory_space<vmem>>, vector<2x8xf32>,
    return
  }
  func.func @transform_0(%arg0: i32) -> (i32, i32) {
    %c0_i32 = arith.constant 0 : i32
    %c0_i32_0 = arith.constant 0 : i32
    return %arg0, %c0_i32 : i32, i32
  }
  func.func @transform_1(%arg0: i32) -> (i32, i32, i32) {
    %c0_i32 = arith.constant 0 : i32
    %c0_i32_0 = arith.constant 0 : i32
    %c0_i32_1 = arith.constant 0 : i32
    return %arg0, %c0_i32, %c0_i32_0 : i32, i32, i32
  }
  func.func @transform_2(%arg0: i32) -> (i32, i32, i32) {
    %c0_i32 = arith.constant 0 : i32
    %c0_i32_0 = arith.constant 0 : i32
    %c0_i32_1 = arith.constant 0 : i32
    return %arg0, %c0_i32, %c0_i32_0 : i32, i32, i32
  }
  func.func @transform_3(%arg0: i32) -> (i32, i32) {
    %c0_i32 = arith.constant 0 : i32
    %c0_i32_0 = arith.constant 0 : i32
    %c0_i32_1 = arith.constant 0 : i32
    return %c0_i32, %c0_i32_0 : i32, i32
  }
  func.func @transform_4(%arg0: i32) -> (i32, i32) {
    %c0_i32 = arith.constant 0 : i32
    %c0_i32_0 = arith.constant 0 : i32
    %c0_i32_1 = arith.constant 0 : i32
    return %c0_i32, %c0_i32_0 : i32, i32
  }
  func.func @transform_5(%arg0: i32) -> (i32, i32) {
    %c0_i32 = arith.constant 0 : i32
    %c0_i32_0 = arith.constant 0 : i32
    %c0_i32_1 = arith.constant 0 : i32
    return %c0_i32, %c0_i32_0 : i32, i32
  }
  func.func @transform_6(%arg0: i32) -> (i32, i32) {
    %c0_i32 = arith.constant 0 : i32
    %c0_i32_0 = arith.constant 0 : i32
    %c0_i32_1 = arith.constant 0 : i32
    return %c0_i32, %c0_i32_0 : i32, i32
  }
  func.func @transform_7(%arg0: i32) -> (i32, i32) {
    %c0_i32 = arith.constant 0 : i32
    %c0_i32_0 = arith.constant 0 : i32
    %c0_i32_1 = arith.constant 0 : i32
    return %c0_i32, %c0_i32_0 : i32, i32
  }
  func.func @transform_8(%arg0: i32) -> (i32, i32) {
    %c0_i32 = arith.constant 0 : i32
    %c0_i32_0 = arith.constant 0 : i32
    %c0_i32_1 = arith.constant 0 : i32
    return %c0_i32, %c0_i32_0 : i32, i32
  }
  func.func @transform_9(%arg0: i32) -> (i32, i32) {
    %c0_i32 = arith.constant 0 : i32
    %c0_i32_0 = arith.constant 0 : i32
    return %arg0, %c0_i32 : i32, i32
  }
  func.func @transform_10(%arg0: i32) -> (i32, i32) {
    %c0_i32 = arith.constant 0 : i32
    %c0_i32_0 = arith.constant 0 : i32
    return %arg0, %c0_i32 : i32, i32
  }
}

</mosaic_0001>

<bundles_post_ra>
// kernel: location_aware_attention.1
= control target key start
LH: loop header
LB: loop body
LE: loop exit
PB: predicated region body
PF: predicated region fallthrough
CT: control target
= control target key end

     0   :  { %17 = vsyncpa [#allocation4], 0  ;;  %s898_s0 = inlined_call_operand.vmem [shape: f32[2,32], index: 0, kind: input, shape index: {}]   ;;  %s899_s1 = inlined_call_operand.vmem [shape: f32[2,8,32], index: 1, kind: input, shape index: {}]   ;;  %s900_s2 = inlined_call_operand.vmem [shape: f32[2,8,3], index: 2, kind: input, shape index: {}]   ;;  %s901_s3 = inlined_call_operand.vmem [shape: f32[32,32], index: 3, kind: input, shape index: {}]   ;;  %s902_s4 = inlined_call_operand.hbm [shape: f32[32,32], index: 4, kind: input, shape index: {}]   ;;  %s903_s5 = inlined_call_operand.vmem [shape: f32[3,32], index: 5, kind: input, shape index: {}]   ;;  %s904_s6 = inlined_call_operand.vmem [shape: f32[1,32], index: 6, kind: input, shape index: {}]   ;;  %s905_s7 = inlined_call_operand.vmem [shape: f32[1,32], index: 7, kind: input, shape index: {}]   ;;  %s906_s8 = inlined_call_operand.<no memory space> [shape: f32[1,1], index: 8, kind: input, shape index: {}]   ;;  %s907_s9 = inlined_call_operand.hbm [shape: f32[2,32], index: 9, kind: output, shape index: {0}]   ;;  %s908_s10 = inlined_call_operand.hbm [shape: f32[2,8], index: 10, kind: output, shape index: {1}]  }
   0x1   :  { %18 = vsyncpa [#allocation5], 0 }
   0x2   :  { %19 = vsyncpa [#allocation8], 0  ;;  %s770_s13 = smov [#allocation3]  }
   0x3   :  { %s33_s14 = sshll.u32 %s770_s13, 4  ;;  %s34_s14 = int_to_ptr.vmem [resolvable:$true] %s33_s14 }
   0x4   :  { %s712_s15 = scalar_lea.vmem %s34_s14, 512  ;;  %p717_p1 = scmp.lt.s32.totalorder %s34_s14, %s34_s14 }
   0x5   :  { %p713_p0 = scmp.ne.s32.totalorder %s34_s14, %s712_s15  ;;  %p718_p2 = scmp.lt.s32.totalorder %s712_s15, %s712_s15 }
   0x7   :  { %p719_p3 = por %p718_p2, %p717_p1 }
   0x9   :  { %p720_p4 = pnand %p719_p3, %p713_p0 }
   0xb   :  { %723 = shalt.err (!%p720_p4)
}
   0xc   :  { %s771_s16 = smov 128   ;;  %s772_s17 = smov 8  }
   0xd   :  { %39 = dma.hbm_to_vmem [thread:$0]  %s902_s4, 512, %s34_s14, [#allocation4], %s771_s16, %s771_s16, %s772_s17  }
   0xe   :  { %764 = dma.done.wait [#allocation4], 512  }
   0xf   :  { %765 = vsyncadd [#allocation4], 4294966784  ;;  %vm157_vm0 = vcmask 1042432   ;;  %v63_v0 = vld [vmem:[#allocation3 + $0x18] sm:$0xff]  ;;  %v64_v1 = vld [vmem:[%s903_s5] sm:$0x7]  ;;  %v321_v17 = vlaneseq  ;;  %v368_v47 = vstv %s906_s8 }
  0x10   :  { %v54_v2 = vld [vmem:[%s900_s2] sm:$0xff]  ;;  %vm150_vm1 = vcmask 23552   ;;  %642 = vmatprep.subr.mxu0 %v63_v0  ;;  %653 = vmatprep.subr.msk.mxu1 %vm157_vm0, %v64_v1  ;;  %v62_v3 = vld [vmem:[#allocation3 + $0x10] sm:$0xff]  ;;  %v55_v4 = vld [vmem:[%s900_s2 + $0x8] sm:$0xff]  ;;  %v773_v7 = vmov 0.0   ;;  %vm68_vm2 = vcmask 261120  }
  0x11   :  { %643 = vmatpush3.msra.mxu0 %v63_v0  ;;  %654 = vmatpush3.msk.msra.mxu1 %vm157_vm0, %v64_v1  ;;  %v59_v5 = vld [vmem:[%s901_s3 + $0x18] sm:$0xff]  ;;  %v61_v6 = vld [vmem:[#allocation3 + $0x8] sm:$0xff]  ;;  %v58_v8 = vld [vmem:[%s901_s3 + $0x10] sm:$0xff]  ;;  %vm774_vm3 = vmmov 0   ;;  %v775_v15 = vmov 1966171168  }
  0x12   :  { %655 = vmatprep.mubr.msk.f32.mxu1 %vm150_vm1, %v54_v2  ;;  %644 = vmatprep.subr.mxu0 %v62_v3  ;;  %v60_v9 = vld [vmem:[#allocation3] sm:$0xff]  ;;  %v57_v11 = vld [vmem:[%s901_s3 + $0x8] sm:$0xff]  ;;  %v319_v16 = vunpack.c.l.s4 %v775_v15  ;;  %v870_v20 = vshrl.u32 %v321_v17, 7  ;;  %v384_v60 = vand.u32 127, %v321_v17  ;;  %vm393_vm4 = vcmask 1041409  }
  0x13   :  { %656 = vmatmul.mubr.msk.f32.vlgmr.msra.gmra.mxu1 %vm150_vm1, %v55_v4  ;;  %658 = vmatprep.subr.mxu1 %v773_v7  ;;  %v52_v10 = vld [vmem:[%s899_s1] sm:$0xff]  ;;  %v53_v12 = vld [vmem:[%s899_s1 + $0x8] sm:$0xff]  ;;  %vm396_vm5 = vcmask 58368   ;;  %v776_v4 = vmov 0   ;;  %vm422_vm6 = vcmask 64512  }
  0x14   :  { %645 = vmatpush3.msra.mxu0 %v62_v3  ;;  %659 = vmatpush3.msra.mxu1 %v59_v5  ;;  %v56_v13 = vld [vmem:[%s901_s3] sm:$0xff]  ;;  %v320_v19 = vunpack.c.0.s8 %v319_v16  ;;  %v342_v29 = vsub.s32 0, %v870_v20  ;;  %v387_v61 = vsub.s32 %v384_v60, %v870_v20 }
  0x15   :  { %646 = vmatprep.subr.mxu0 %v61_v6  ;;  %660 = vmatprep.subr.mxu1 %v773_v7  ;;  %v51_v14 = vld [vmem:[%s898_s0] sm:$0x3] }
  0x16   :  { %647 = vmatpush3.msra.mxu0 %v61_v6  ;;  %661 = vmatpush3.msra.mxu1 %v58_v8  ;;  %v619_v22 = vld [vmem:[%s904_s6] ss:$0 sm:$0xff]  ;;  %v323_v23 = vsub.s32 %v320_v19, %v870_v20  ;;  %v408_v6 = vsub.s32 1, %v870_v20 }
  0x17   :  { %648 = vmatprep.subr.mxu0 %v60_v9  ;;  %662 = vmatprep.subr.mxu1 %v773_v7  ;;  %v621_v40 = vld [vmem:[%s905_s7] ss:$0 sm:$0xff]  ;;  %s777_s7 = smov [#allocation7]  }
  0x18   :  { %649 = vmatpush3.msra.mxu0 %v60_v9  ;;  %650 = vmatprep.mubr.msk.f32.mxu0 %vm68_vm2, %v52_v10  ;;  %s601_s8 = sshll.u32 %s777_s7, 4  ;;  %s602_s8 = int_to_ptr.vmem [resolvable:$true] %s601_s8 }
  0x19   :  { %663 = vmatpush3.msra.mxu1 %v57_v11  ;;  %651 = vmatmul.mubr.msk.f32.vlgmr.msra.gmra.mxu0 %vm68_vm2, %v53_v12  ;;  %s724_s19 = scalar_lea.vmem %s602_s8, 32  ;;  %p729_p6 = scmp.lt.s32.totalorder %s602_s8, %s602_s8 }
  0x1a   :  { %664 = vmatprep.subr.mxu1 %v773_v7  ;;  %666 = vmatprep.mubr.msk.f32.mxu1 %vm774_vm3, %v773_v7  ;;  %p725_p5 = scmp.ne.s32.totalorder %s602_s8, %s724_s19  ;;  %p730_p7 = scmp.lt.s32.totalorder %s724_s19, %s724_s19 }
  0x1b   :  { %665 = vmatpush3.msra.mxu1 %v56_v13  ;;  %669 = vmatprep.subr.mxu0 %v773_v7 }
  0x1c   :  { %667 = vmatmul.mubr.msk.f32.vlgmr.msra.gmra.mxu1 %vm68_vm2, %v51_v14  ;;  %674 = vmatprep.subr.mxu1 %v773_v7  ;;  %p731_p8 = por %p730_p7, %p729_p6 }
  0x1d   :  { %675 = vmatpush3.msra.mxu1 %v53_v12  ;;  %670 = vmatpush3.msra.mxu0 %v52_v10 }
  0x1e   :  { %671 = vmatprep.mubr.msk.f32.mxu0 %vm774_vm3, %v773_v7  ;;  %676 = vmatprep.mubr.msk.f32.mxu1 %vm774_vm3, %v773_v7  ;;  %p732_p9 = pnand %p731_p8, %p725_p5 }
  0x1f   :  { %689 = vset.pattern.permute.xlu0 %v776_v4  ;;  %688 = vset.pattern.permute.xlu1 %v776_v4 }
  0xd3   :  { %v657_v18 = vpop.f32.mrf.mxu1 }
  0xd5   :  { %v227_v21 = vpop.f32.mrf.mxu1 }
  0xd9   :  { %v652_v24 = vpop.f32.mrf.mxu0 }
  0xda   :  { %v316_v36 = vadd.f32 %v657_v18, %v652_v24 }
  0xdb   :  { %v141_v30 = vpop.f32.mrf.mxu0 }
  0xdc   :  { %v311_v25 = vpop.f32.mrf.mxu1  ;;  %v315_v33 = vadd.f32 %v227_v21, %v141_v30 }
  0xdd   :  { %v312_v26 = vadd.f32 %v619_v22, %v311_v25 }
  0xde   :  { %v668_v27 = vpop.f32.mrf.mxu1 }
  0xdf   :  { %v324_v28 = vrot.slane %v312_v26, %v323_v23 }
  0xe1   :  { %v325_v31 = vcombine.high %v324_v28, %v324_v28  ;;  %v332_v32 = vrot.slane %v324_v28, %v323_v23 }
  0xe3   :  { %v339_v34 = vrot.slane %v325_v31, %v323_v23  ;;  %v343_v35 = vrot.slane %v332_v32, %v342_v29 }
  0xe5   :  { %v347_v37 = vrot.slane %v339_v34, %v342_v29  ;;  %v350_v38 = vadd.f32 %v343_v35, %v315_v33 }
  0xe7   :  { %v351_v39 = vadd.f32 %v347_v37, %v316_v36  ;;  %690 = vtanh.f32 %v350_v38 }
  0xe9   :  { %692 = vtanh.f32 %v351_v39 }
  0xf4   :  { %v691_v41 = vpop.eup %690 }
  0xf5   :  { %v360_v42 = vmul.f32 %v691_v41, %v621_v40 }
  0xf6   :  { %v693_v43 = vpop.eup %692 }
  0xf7   :  { %v362_v44 = vsel %vm68_vm2, %v360_v42, 0.0  ;;  %v361_v45 = vmul.f32 %v693_v43, %v621_v40 }
  0xf8   :  { %363 = vadd.xlane.f32.xlu0 %v362_v44 }
  0xf9   :  { %v365_v46 = vsel %vm68_vm2, %v361_v45, 0.0 }
  0xfc   :  { %366 = vadd.xlane.f32.xlu0 %v365_v46 }
 0x181   :  { %v364_v48 = vpop.xlane.xlu0 %363 }
 0x182   :  { %v369_v49 = vadd.f32 %v368_v47, %v364_v48 }
 0x184   :  { %v371_v50 = vsub.f32 0.0, %v369_v49 }
 0x185   :  { %v367_v51 = vpop.xlane.xlu0 %366 }
 0x186   :  { %v373_v52 = vmul.f32 1.442695, %v371_v50  ;;  %v370_v53 = vadd.f32 %v368_v47, %v367_v51 }
 0x188   :  { %694 = vpow2.f32 %v373_v52  ;;  %v372_v54 = vsub.f32 0.0, %v370_v53 }
 0x18a   :  { %v375_v55 = vmul.f32 1.442695, %v372_v54 }
 0x18c   :  { %696 = vpow2.f32 %v375_v55 }
 0x195   :  { %v695_v56 = vpop.eup %694 }
 0x196   :  { %v377_v57 = vadd.f32 1.0, %v695_v56 }
 0x198   :  { %698 = vrcp.f32 %v377_v57 }
 0x199   :  { %v697_v58 = vpop.eup %696 }
 0x19a   :  { %v378_v59 = vadd.f32 1.0, %v697_v58 }
 0x19c   :  { %700 = vrcp.f32 %v378_v59 }
 0x1a5   :  { %v699_v62 = vpop.eup %698 }
 0x1a6   :  { %v388_v0 = vrot.slane %v699_v62, %v387_v61 }
 0x1a9   :  { %v701_v63 = vpop.eup %700 }
 0x1aa   :  { %v392_v1 = vrot.slane %v701_v63, %v387_v61 }
 0x1ac   :  { %v394_v2 = vsel %vm393_vm4, %v392_v1, %v388_v0 }
 0x1ad   :  { %v397_v3 = vsel %vm396_vm5, %v394_v2, 0.0 }
 0x1ae   :  { %398 = vadd.xlane.f32.xlu1 %v397_v3 }
 0x237   :  { %v399_v5 = vpop.xlane.xlu1 %398 }
 0x238   :  { %702 = vrcp.f32 %v399_v5 }
 0x245   :  { %v703_v7 = vpop.eup %702 }
 0x246   :  { %v409_v8 = vrot.slane %v703_v7, %v408_v6  ;;  %v405_v9 = vrot.slane %v703_v7, %v342_v29 }
 0x248   :  { %v413_v10 = vmul.f32 %v701_v63, %v409_v8  ;;  %v412_v11 = vmul.f32 %v699_v62, %v405_v9 }
 0x24a   :  { %497 = vperm.xlu1 %688, %v413_v10   ;;  %416 = vperm.xlu0 %689, %v412_v11  }
 0x2c5   :  { %v498_v12 = vpop.permute.xlu1 %497  ;;  %v417_v13 = vpop.permute.xlu0 %416 }
 0x2c6   :  { %v502_v14 = vrot.slane %v498_v12, %v387_v61  ;;  %v421_v15 = vrot.slane %v417_v13, %v387_v61 }
 0x2c8   :  { %672 = vmatmul.mubr.msk.f32.vlgmr.msra.gmra.mxu0 %vm422_vm6, %v421_v15  ;;  %677 = vmatmul.mubr.msk.f32.vlgmr.msra.gmra.mxu1 %vm422_vm6, %v502_v14  ;;  %v582_v16 = vsel %vm393_vm4, %v502_v14, %v421_v15 }
 0x2c9   :  { %584 = vst.msk [vmem:[#allocation7] sm:$0x3] %vm396_vm5, %v582_v16 }
 0x2ca   :  { %735 = shalt.err (!%p732_p9)
}
 0x2cb   :  { %604 = dma.vmem_to_hbm [thread:$0]  %s602_s8, 32, %s908_s10, [#allocation8]   ;;  %vm580_vm7 = vcmask 254976  }
 0x2cc   :  { %s778_s22 = smov [#allocation6]  }
 0x2cd   :  { %s591_s23 = sshll.u32 %s778_s22, 4  ;;  %s592_s23 = int_to_ptr.vmem [resolvable:$true] %s591_s23 }
 0x2ce   :  { %s744_s24 = scalar_lea.vmem %s592_s23, 32  ;;  %p749_p11 = scmp.lt.s32.totalorder %s592_s23, %s592_s23 }
 0x2cf   :  { %p745_p10 = scmp.ne.s32.totalorder %s592_s23, %s744_s24  ;;  %p750_p12 = scmp.lt.s32.totalorder %s744_s24, %s744_s24 }
 0x2d1   :  { %p751_p13 = por %p750_p12, %p749_p11 }
 0x2d3   :  { %p752_p0 = pnand %p751_p13, %p745_p10 }
 0x388   :  { %v491_v17 = vpop.f32.mrf.mxu0  ;;  %v571_v18 = vpop.f32.mrf.mxu1 }
 0x389   :  { %v577_v19 = vrot.slane %v571_v18, 7 }
 0x38a   :  { %v673_v20 = vpop.f32.mrf.mxu0  ;;  %v678_v21 = vpop.f32.mrf.mxu1 }
 0x38b   :  { %v578_v22 = vsel %vm393_vm4, %v577_v19, %v491_v17 }
 0x38c   :  { %581 = vst.msk [vmem:[#allocation6] sm:$0x3] %vm580_vm7, %v578_v22 }
 0x38d   :  { %755 = shalt.err (!%p752_p0)
}
 0x38e   :  { %594 = dma.vmem_to_hbm [thread:$0]  %s592_s23, 32, %s907_s9, [#allocation5]  }
 0x38f   :  { %766 = dma.done.wait [#allocation5], 32  }
 0x390   :  { %767 = vsyncadd [#allocation5], 4294967264 }
 0x391   :  { %768 = dma.done.wait [#allocation8], 32  }
 0x392   :  { %769 = vsyncadd [#allocation8], 4294967264 }
 0x393   :  { %611 = vsyncpa [#allocation4], 1 }
 0x394   :  { %612 = vsyncpa [#allocation5], 1 }
 0x395   :  { %613 = vsyncpa [#allocation8], 1 }

</bundles_post_ra>
